<compile_context>
chip_gen: v5e
topology: v5e:2x2
jax: 0.10.0
libtpu: 0.0.40
codegen_flags: <defaults>
</compile_context>

<pallas_src>
import jax
import jax.numpy as jnp
from jax.experimental import pallas as pl
from jax.experimental.pallas import tpu as pltpu

NUM_CLASSES = 3  # typical HPA head (bg / border / interior)
_LANE = 128

# MeanStdNormalize constants from the module
_MEAN = jnp.asarray([124 / 255.0, 117 / 255.0, 104 / 255.0], dtype=jnp.float32)
_STD = jnp.asarray([1 / (0.0167 * 255.0)] * 3, dtype=jnp.float32)


def _fused_kernel(p_ref, blue_ref, red_ref, yellow_ref, nu_ref, cell_ref):
    """One (batch, spatial-tile) grid step; both segmentation branches fused.

    p_ref:   (18,) f32 in SMEM -- folded (normalize + 1x1-conv) parameters:
             [0:3]   nuclei per-class weight (summed over its 3 identical inputs)
             [3:6]   nuclei per-class bias
             [6:15]  cell 3x3 weight, row-major (class, input-channel = r,y,b)
             [15:18] cell per-class bias
    blue/red/yellow_ref: (TR, 128) f32 tiles of data channels 2 / 0 / 3
    nu_ref / cell_ref:   (NUM_CLASSES, TR, 128) f32 channel-softmax outputs
    """
    blue = blue_ref[...]
    red = red_ref[...]
    yellow = yellow_ref[...]

    # ---- nuclei branch: all 3 model inputs are the blue channel ----
    ln0 = p_ref[0] * blue + p_ref[3]
    ln1 = p_ref[1] * blue + p_ref[4]
    ln2 = p_ref[2] * blue + p_ref[5]
    mn = jnp.maximum(jnp.maximum(ln0, ln1), ln2)
    e0 = jnp.exp(ln0 - mn)
    e1 = jnp.exp(ln1 - mn)
    e2 = jnp.exp(ln2 - mn)
    inv_n = pl.reciprocal(e0 + e1 + e2, approx=False)  # exact, keeps 1e-5 tolerance
    nu_ref[0] = e0 * inv_n
    nu_ref[1] = e1 * inv_n
    nu_ref[2] = e2 * inv_n

    # ---- cell branch: model inputs are (red, yellow, blue) = data[:, (0,3,2)] ----
    lc0 = p_ref[6] * red + p_ref[7] * yellow + p_ref[8] * blue + p_ref[15]
    lc1 = p_ref[9] * red + p_ref[10] * yellow + p_ref[11] * blue + p_ref[16]
    lc2 = p_ref[12] * red + p_ref[13] * yellow + p_ref[14] * blue + p_ref[17]
    mc = jnp.maximum(jnp.maximum(lc0, lc1), lc2)
    f0 = jnp.exp(lc0 - mc)
    f1 = jnp.exp(lc1 - mc)
    f2 = jnp.exp(lc2 - mc)
    inv_c = pl.reciprocal(f0 + f1 + f2, approx=False)
    cell_ref[0] = f0 * inv_c
    cell_ref[1] = f1 * inv_c
    cell_ref[2] = f2 * inv_c


def _pick_row_tile(rows):
    """Rows (= HW/128) per spatial tile; full extent when small, else mult. of 8."""
    if rows <= 512:
        return rows
    for t in (512, 256, 128, 64, 32, 16, 8):
        if rows % t == 0:
            return t
    return rows


def _fold_params(w, b):
    """Fold MeanStdNormalize into the 1x1 conv: w@((x-mean)/std)+b == w'@x+b'."""
    inv_std = 1.0 / _STD                                    # (3,)
    w_f = w * inv_std[None, :]                              # (K, 3)
    b_f = b - jnp.sum(w * (_MEAN * inv_std)[None, :], axis=1)
    return w_f, b_f


def cell_segmentation_forward(data, w_nu, b_nu, w_cell, b_cell):
    """Mirror of CellSegmentation.forward.

    data: (B, C>=4, H, W) float32 NCHW.
    Returns (x_nuclei, x_cells), each (B, NUM_CLASSES, H, W) channel-softmax probs.
    """
    B, C, H, W = data.shape
    assert C >= 4
    HW = H * W
    assert HW % _LANE == 0, "spatial size must be a multiple of 128"
    R = HW // _LANE
    TR = _pick_row_tile(R)
    grid = (B, R // TR)

    # Lane-dense view: each channel plane becomes (R, 128).
    x = data.reshape(B, C, R, _LANE)

    # Fold normalization into the (synthetic) 1x1-conv heads.
    w_nu_f, b_nu_f = _fold_params(w_nu, b_nu)
    w_cell_f, b_cell_f = _fold_params(w_cell, b_cell)
    wsum_nu = jnp.sum(w_nu_f, axis=1)  # nuclei model sees 3 copies of blue
    params = jnp.concatenate(
        [wsum_nu, b_nu_f, w_cell_f.reshape(-1), b_cell_f]).astype(jnp.float32)  # (18,)

    def chan_spec(ch):
        # Batch and channel dims squeezed; pull only the needed channel plane.
        return pl.BlockSpec((None, None, TR, _LANE), lambda b, s: (b, ch, s, 0))

    out_spec = pl.BlockSpec((None, NUM_CLASSES, TR, _LANE), lambda b, s: (b, 0, s, 0))

    nu, cells = pl.pallas_call(
        _fused_kernel,
        grid=grid,
        in_specs=[
            pl.BlockSpec(memory_space=pltpu.MemorySpace.SMEM),  # folded params
            chan_spec(2),   # blue   (data channel 2)
            chan_spec(0),   # red    (data channel 0)
            chan_spec(3),   # yellow (data channel 3)
        ],
        out_specs=(out_spec, out_spec),
        out_shape=(
            jax.ShapeDtypeStruct((B, NUM_CLASSES, R, _LANE), jnp.float32),
            jax.ShapeDtypeStruct((B, NUM_CLASSES, R, _LANE), jnp.float32),
        ),
        compiler_params=pltpu.CompilerParams(
            dimension_semantics=("parallel", "parallel")),
    )(params, x, x, x)

    return (nu.reshape(B, NUM_CLASSES, H, W),
            cells.reshape(B, NUM_CLASSES, H, W))


def _reference_branch(x_3ch, w, b):
    """Pure-JAX reference (unfolded normalize -> 1x1 conv -> softmax)."""
    xn = (x_3ch - _MEAN[None, :, None, None]) / _STD[None, :, None, None]
    logits = jnp.einsum("kc,bchw->bkhw", w, xn) + b[None, :, None, None]
    return jax.nn.softmax(logits, axis=1)


if __name__ == "__main__":
    key = jax.random.PRNGKey(0)
    k_data, k_wn, k_bn, k_wc, k_bc = jax.random.split(key, 5)

    B, C, H, W = 2, 4, 16, 16
    data = jax.random.uniform(k_data, (B, C, H, W), dtype=jnp.float32)

    # Deterministic synthetic parameters for the two segmentation heads.
    w_nu = 0.1 * jax.random.normal(k_wn, (NUM_CLASSES, 3), dtype=jnp.float32)
    b_nu = 0.1 * jax.random.normal(k_bn, (NUM_CLASSES,), dtype=jnp.float32)
    w_cell = 0.1 * jax.random.normal(k_wc, (NUM_CLASSES, 3), dtype=jnp.float32)
    b_cell = 0.1 * jax.random.normal(k_bc, (NUM_CLASSES,), dtype=jnp.float32)

    x_nuclei, x_cells = cell_segmentation_forward(data, w_nu, b_nu, w_cell, b_cell)
    jax.block_until_ready((x_nuclei, x_cells))

    # Sanity check against pure-JAX reference (no extra output on success).
    data_blue = jnp.broadcast_to(data[:, 2:3, :, :], (B, 3, H, W))
    data_ryb = data[:, jnp.array([0, 3, 2]), :, :]
    ref_nuclei = _reference_branch(data_blue, w_nu, b_nu)
    ref_cells = _reference_branch(data_ryb, w_cell, b_cell)
    assert x_nuclei.shape == (B, NUM_CLASSES, H, W)
    assert x_cells.shape == (B, NUM_CLASSES, H, W)
    assert jnp.allclose(x_nuclei, ref_nuclei, atol=1e-5, rtol=1e-5)
    assert jnp.allclose(x_cells, ref_cells, atol=1e-5, rtol=1e-5)

    print("KERNEL_OK")
</pallas_src>

<mosaic_0001>
module attributes {stable_mosaic.version = 11 : i64} {
  func.func @_fused_kernel(%arg0: i32, %arg1: i32, %arg2: memref<18xf32, #tpu.memory_space<smem>>, %arg3: memref<1x1x2x128xf32, #tpu.memory_space<vmem>>, %arg4: memref<1x1x2x128xf32, #tpu.memory_space<vmem>>, %arg5: memref<1x1x2x128xf32, #tpu.memory_space<vmem>>, %arg6: memref<1x3x2x128xf32, #tpu.memory_space<vmem>>, %arg7: memref<1x3x2x128xf32, #tpu.memory_space<vmem>>) attributes {dimension_semantics = [#tpu.dimension_semantics<parallel>, #tpu.dimension_semantics<parallel>], iteration_bounds = array<i64: 2, 1>, scalar_prefetch = 0 : i64, scratch_operands = 0 : i64, tpu.core_type = #tpu.core_type<tc>, window_params = [{transform_indices = @transform_0, window_bounds = array<i64: 18>}, {transform_indices = @transform_1, window_bounds = array<i64: 1, 1, 2, 128>}, {transform_indices = @transform_2, window_bounds = array<i64: 1, 1, 2, 128>}, {transform_indices = @transform_3, window_bounds = array<i64: 1, 1, 2, 128>}, {transform_indices = @transform_4, window_bounds = array<i64: 1, 3, 2, 128>}, {transform_indices = @transform_5, window_bounds = array<i64: 1, 3, 2, 128>}]} {
    %c0 = arith.constant 0 : index
    %c0_0 = arith.constant 0 : index
    %c0_1 = arith.constant 0 : index
    %c0_2 = arith.constant 0 : index
    %0 = vector.load %arg3[%c0, %c0_0, %c0_1, %c0_2] : memref<1x1x2x128xf32, #tpu.memory_space<vmem>>, vector<1x1x2x128xf32>
    %1 = vector.shape_cast %0 : vector<1x1x2x128xf32> to vector<2x128xf32>
    %c0_3 = arith.constant 0 : index
    %c0_4 = arith.constant 0 : index
    %c0_5 = arith.constant 0 : index
    %c0_6 = arith.constant 0 : index
    %2 = vector.load %arg4[%c0_3, %c0_4, %c0_5, %c0_6] : memref<1x1x2x128xf32, #tpu.memory_space<vmem>>, vector<1x1x2x128xf32>
    %3 = vector.shape_cast %2 : vector<1x1x2x128xf32> to vector<2x128xf32>
    %c0_7 = arith.constant 0 : index
    %c0_8 = arith.constant 0 : index
    %c0_9 = arith.constant 0 : index
    %c0_10 = arith.constant 0 : index
    %4 = vector.load %arg5[%c0_7, %c0_8, %c0_9, %c0_10] : memref<1x1x2x128xf32, #tpu.memory_space<vmem>>, vector<1x1x2x128xf32>
    %5 = vector.shape_cast %4 : vector<1x1x2x128xf32> to vector<2x128xf32>
    %c0_11 = arith.constant 0 : index
    %6 = memref.load %arg2[%c0_11] : memref<18xf32, #tpu.memory_space<smem>>
    %7 = vector.broadcast %6 : f32 to vector<2x128xf32>
    %8 = arith.mulf %7, %1 : vector<2x128xf32>
    %c3 = arith.constant 3 : index
    %9 = memref.load %arg2[%c3] : memref<18xf32, #tpu.memory_space<smem>>
    %10 = vector.broadcast %9 : f32 to vector<2x128xf32>
    %11 = arith.addf %8, %10 : vector<2x128xf32>
    %c1 = arith.constant 1 : index
    %12 = memref.load %arg2[%c1] : memref<18xf32, #tpu.memory_space<smem>>
    %13 = vector.broadcast %12 : f32 to vector<2x128xf32>
    %14 = arith.mulf %13, %1 : vector<2x128xf32>
    %c4 = arith.constant 4 : index
    %15 = memref.load %arg2[%c4] : memref<18xf32, #tpu.memory_space<smem>>
    %16 = vector.broadcast %15 : f32 to vector<2x128xf32>
    %17 = arith.addf %14, %16 : vector<2x128xf32>
    %c2 = arith.constant 2 : index
    %18 = memref.load %arg2[%c2] : memref<18xf32, #tpu.memory_space<smem>>
    %19 = vector.broadcast %18 : f32 to vector<2x128xf32>
    %20 = arith.mulf %19, %1 : vector<2x128xf32>
    %c5 = arith.constant 5 : index
    %21 = memref.load %arg2[%c5] : memref<18xf32, #tpu.memory_space<smem>>
    %22 = vector.broadcast %21 : f32 to vector<2x128xf32>
    %23 = arith.addf %20, %22 : vector<2x128xf32>
    %24 = arith.maximumf %11, %17 : vector<2x128xf32>
    %25 = arith.maximumf %24, %23 : vector<2x128xf32>
    %26 = arith.subf %11, %25 : vector<2x128xf32>
    %27 = math.exp %26 : vector<2x128xf32>
    %28 = arith.subf %17, %25 : vector<2x128xf32>
    %29 = math.exp %28 : vector<2x128xf32>
    %30 = arith.subf %23, %25 : vector<2x128xf32>
    %31 = math.exp %30 : vector<2x128xf32>
    %32 = arith.addf %27, %29 : vector<2x128xf32>
    %33 = arith.addf %32, %31 : vector<2x128xf32>
    %34 = tpu.reciprocal %33 : vector<2x128xf32> -> vector<2x128xf32>
    %35 = arith.mulf %27, %34 : vector<2x128xf32>
    %c0_12 = arith.constant 0 : index
    %c0_13 = arith.constant 0 : index
    %c0_14 = arith.constant 0 : index
    %c0_15 = arith.constant 0 : index
    %36 = vector.load %arg6[%c0_12, %c0_13, %c0_14, %c0_15] : memref<1x3x2x128xf32, #tpu.memory_space<vmem>>, vector<1x1x2x128xf32>
    %37 = vector.shape_cast %36 : vector<1x1x2x128xf32> to vector<2x128xf32>
    %38 = vector.shape_cast %35 : vector<2x128xf32> to vector<1x1x2x128xf32>
    tpu.vector_store %arg6[%c0_12, %c0_13, %c0_14, %c0_15], %38 {strides = array<i32>} : memref<1x3x2x128xf32, #tpu.memory_space<vmem>>, vector<1x1x2x128xf32>,
    %39 = arith.mulf %29, %34 : vector<2x128xf32>
    %c0_16 = arith.constant 0 : index
    %c1_17 = arith.constant 1 : index
    %c0_18 = arith.constant 0 : index
    %c0_19 = arith.constant 0 : index
    %40 = vector.load %arg6[%c0_16, %c1_17, %c0_18, %c0_19] : memref<1x3x2x128xf32, #tpu.memory_space<vmem>>, vector<1x1x2x128xf32>
    %41 = vector.shape_cast %40 : vector<1x1x2x128xf32> to vector<2x128xf32>
    %42 = vector.shape_cast %39 : vector<2x128xf32> to vector<1x1x2x128xf32>
    tpu.vector_store %arg6[%c0_16, %c1_17, %c0_18, %c0_19], %42 {strides = array<i32>} : memref<1x3x2x128xf32, #tpu.memory_space<vmem>>, vector<1x1x2x128xf32>,
    %43 = arith.mulf %31, %34 : vector<2x128xf32>
    %c0_20 = arith.constant 0 : index
    %c2_21 = arith.constant 2 : index
    %c0_22 = arith.constant 0 : index
    %c0_23 = arith.constant 0 : index
    %44 = vector.load %arg6[%c0_20, %c2_21, %c0_22, %c0_23] : memref<1x3x2x128xf32, #tpu.memory_space<vmem>>, vector<1x1x2x128xf32>
    %45 = vector.shape_cast %44 : vector<1x1x2x128xf32> to vector<2x128xf32>
    %46 = vector.shape_cast %43 : vector<2x128xf32> to vector<1x1x2x128xf32>
    tpu.vector_store %arg6[%c0_20, %c2_21, %c0_22, %c0_23], %46 {strides = array<i32>} : memref<1x3x2x128xf32, #tpu.memory_space<vmem>>, vector<1x1x2x128xf32>,
    %c6 = arith.constant 6 : index
    %47 = memref.load %arg2[%c6] : memref<18xf32, #tpu.memory_space<smem>>
    %48 = vector.broadcast %47 : f32 to vector<2x128xf32>
    %49 = arith.mulf %48, %3 : vector<2x128xf32>
    %c7 = arith.constant 7 : index
    %50 = memref.load %arg2[%c7] : memref<18xf32, #tpu.memory_space<smem>>
    %51 = vector.broadcast %50 : f32 to vector<2x128xf32>
    %52 = arith.mulf %51, %5 : vector<2x128xf32>
    %53 = arith.addf %49, %52 : vector<2x128xf32>
    %c8 = arith.constant 8 : index
    %54 = memref.load %arg2[%c8] : memref<18xf32, #tpu.memory_space<smem>>
    %55 = vector.broadcast %54 : f32 to vector<2x128xf32>
    %56 = arith.mulf %55, %1 : vector<2x128xf32>
    %57 = arith.addf %53, %56 : vector<2x128xf32>
    %c15 = arith.constant 15 : index
    %58 = memref.load %arg2[%c15] : memref<18xf32, #tpu.memory_space<smem>>
    %59 = vector.broadcast %58 : f32 to vector<2x128xf32>
    %60 = arith.addf %57, %59 : vector<2x128xf32>
    %c9 = arith.constant 9 : index
    %61 = memref.load %arg2[%c9] : memref<18xf32, #tpu.memory_space<smem>>
    %62 = vector.broadcast %61 : f32 to vector<2x128xf32>
    %63 = arith.mulf %62, %3 : vector<2x128xf32>
    %c10 = arith.constant 10 : index
    %64 = memref.load %arg2[%c10] : memref<18xf32, #tpu.memory_space<smem>>
    %65 = vector.broadcast %64 : f32 to vector<2x128xf32>
    %66 = arith.mulf %65, %5 : vector<2x128xf32>
    %67 = arith.addf %63, %66 : vector<2x128xf32>
    %c11 = arith.constant 11 : index
    %68 = memref.load %arg2[%c11] : memref<18xf32, #tpu.memory_space<smem>>
    %69 = vector.broadcast %68 : f32 to vector<2x128xf32>
    %70 = arith.mulf %69, %1 : vector<2x128xf32>
    %71 = arith.addf %67, %70 : vector<2x128xf32>
    %c16 = arith.constant 16 : index
    %72 = memref.load %arg2[%c16] : memref<18xf32, #tpu.memory_space<smem>>
    %73 = vector.broadcast %72 : f32 to vector<2x128xf32>
    %74 = arith.addf %71, %73 : vector<2x128xf32>
    %c12 = arith.constant 12 : index
    %75 = memref.load %arg2[%c12] : memref<18xf32, #tpu.memory_space<smem>>
    %76 = vector.broadcast %75 : f32 to vector<2x128xf32>
    %77 = arith.mulf %76, %3 : vector<2x128xf32>
    %c13 = arith.constant 13 : index
    %78 = memref.load %arg2[%c13] : memref<18xf32, #tpu.memory_space<smem>>
    %79 = vector.broadcast %78 : f32 to vector<2x128xf32>
    %80 = arith.mulf %79, %5 : vector<2x128xf32>
    %81 = arith.addf %77, %80 : vector<2x128xf32>
    %c14 = arith.constant 14 : index
    %82 = memref.load %arg2[%c14] : memref<18xf32, #tpu.memory_space<smem>>
    %83 = vector.broadcast %82 : f32 to vector<2x128xf32>
    %84 = arith.mulf %83, %1 : vector<2x128xf32>
    %85 = arith.addf %81, %84 : vector<2x128xf32>
    %c17 = arith.constant 17 : index
    %86 = memref.load %arg2[%c17] : memref<18xf32, #tpu.memory_space<smem>>
    %87 = vector.broadcast %86 : f32 to vector<2x128xf32>
    %88 = arith.addf %85, %87 : vector<2x128xf32>
    %89 = arith.maximumf %60, %74 : vector<2x128xf32>
    %90 = arith.maximumf %89, %88 : vector<2x128xf32>
    %91 = arith.subf %60, %90 : vector<2x128xf32>
    %92 = math.exp %91 : vector<2x128xf32>
    %93 = arith.subf %74, %90 : vector<2x128xf32>
    %94 = math.exp %93 : vector<2x128xf32>
    %95 = arith.subf %88, %90 : vector<2x128xf32>
    %96 = math.exp %95 : vector<2x128xf32>
    %97 = arith.addf %92, %94 : vector<2x128xf32>
    %98 = arith.addf %97, %96 : vector<2x128xf32>
    %99 = tpu.reciprocal %98 : vector<2x128xf32> -> vector<2x128xf32>
    %100 = arith.mulf %92, %99 : vector<2x128xf32>
    %c0_24 = arith.constant 0 : index
    %c0_25 = arith.constant 0 : index
    %c0_26 = arith.constant 0 : index
    %c0_27 = arith.constant 0 : index
    %101 = vector.load %arg7[%c0_24, %c0_25, %c0_26, %c0_27] : memref<1x3x2x128xf32, #tpu.memory_space<vmem>>, vector<1x1x2x128xf32>
    %102 = vector.shape_cast %101 : vector<1x1x2x128xf32> to vector<2x128xf32>
    %103 = vector.shape_cast %100 : vector<2x128xf32> to vector<1x1x2x128xf32>
    tpu.vector_store %arg7[%c0_24, %c0_25, %c0_26, %c0_27], %103 {strides = array<i32>} : memref<1x3x2x128xf32, #tpu.memory_space<vmem>>, vector<1x1x2x128xf32>,
    %104 = arith.mulf %94, %99 : vector<2x128xf32>
    %c0_28 = arith.constant 0 : index
    %c1_29 = arith.constant 1 : index
    %c0_30 = arith.constant 0 : index
    %c0_31 = arith.constant 0 : index
    %105 = vector.load %arg7[%c0_28, %c1_29, %c0_30, %c0_31] : memref<1x3x2x128xf32, #tpu.memory_space<vmem>>, vector<1x1x2x128xf32>
    %106 = vector.shape_cast %105 : vector<1x1x2x128xf32> to vector<2x128xf32>
    %107 = vector.shape_cast %104 : vector<2x128xf32> to vector<1x1x2x128xf32>
    tpu.vector_store %arg7[%c0_28, %c1_29, %c0_30, %c0_31], %107 {strides = array<i32>} : memref<1x3x2x128xf32, #tpu.memory_space<vmem>>, vector<1x1x2x128xf32>,
    %108 = arith.mulf %96, %99 : vector<2x128xf32>
    %c0_32 = arith.constant 0 : index
    %c2_33 = arith.constant 2 : index
    %c0_34 = arith.constant 0 : index
    %c0_35 = arith.constant 0 : index
    %109 = vector.load %arg7[%c0_32, %c2_33, %c0_34, %c0_35] : memref<1x3x2x128xf32, #tpu.memory_space<vmem>>, vector<1x1x2x128xf32>
    %110 = vector.shape_cast %109 : vector<1x1x2x128xf32> to vector<2x128xf32>
    %111 = vector.shape_cast %108 : vector<2x128xf32> to vector<1x1x2x128xf32>
    tpu.vector_store %arg7[%c0_32, %c2_33, %c0_34, %c0_35], %111 {strides = array<i32>} : memref<1x3x2x128xf32, #tpu.memory_space<vmem>>, vector<1x1x2x128xf32>,
    return
  }
  func.func @transform_0(%arg0: i32, %arg1: i32) -> i32 {
    %c0_i32 = arith.constant 0 : i32
    %c0_i32_0 = arith.constant 0 : i32
    return %c0_i32 : i32
  }
  func.func @transform_1(%arg0: i32, %arg1: i32) -> (i32, i32, i32, i32) {
    %c2_i32 = arith.constant 2 : i32
    %c0_i32 = arith.constant 0 : i32
    %c0_i32_0 = arith.constant 0 : i32
    return %arg0, %c2_i32, %arg1, %c0_i32 : i32, i32, i32, i32
  }
  func.func @transform_2(%arg0: i32, %arg1: i32) -> (i32, i32, i32, i32) {
    %c0_i32 = arith.constant 0 : i32
    %c0_i32_0 = arith.constant 0 : i32
    %c0_i32_1 = arith.constant 0 : i32
    return %arg0, %c0_i32, %arg1, %c0_i32_0 : i32, i32, i32, i32
  }
  func.func @transform_3(%arg0: i32, %arg1: i32) -> (i32, i32, i32, i32) {
    %c3_i32 = arith.constant 3 : i32
    %c0_i32 = arith.constant 0 : i32
    %c0_i32_0 = arith.constant 0 : i32
    return %arg0, %c3_i32, %arg1, %c0_i32 : i32, i32, i32, i32
  }
  func.func @transform_4(%arg0: i32, %arg1: i32) -> (i32, i32, i32, i32) {
    %c0_i32 = arith.constant 0 : i32
    %c0_i32_0 = arith.constant 0 : i32
    %c0_i32_1 = arith.constant 0 : i32
    return %arg0, %c0_i32, %arg1, %c0_i32_0 : i32, i32, i32, i32
  }
  func.func @transform_5(%arg0: i32, %arg1: i32) -> (i32, i32, i32, i32) {
    %c0_i32 = arith.constant 0 : i32
    %c0_i32_0 = arith.constant 0 : i32
    %c0_i32_1 = arith.constant 0 : i32
    return %arg0, %c0_i32, %arg1, %c0_i32_0 : i32, i32, i32, i32
  }
}

</mosaic_0001>

<bundles_post_ra>
// kernel: tpu_custom_call.1
= control target key start
LH: loop header
LB: loop body
LE: loop exit
PB: predicated region body
PF: predicated region fallthrough
CT: control target
= control target key end

     0   :  { %s1371_s0 = inlined_call_operand.hbm [shape: f32[18], index: 0, kind: input, shape index: {}]   ;;  %s1372_s1 = inlined_call_operand.hbm [shape: f32[2,4,2,128], index: 1, kind: input, shape index: {}]   ;;  %s1373_s2 = inlined_call_operand.hbm [shape: f32[2,4,2,128], index: 2, kind: input, shape index: {}]   ;;  %s1374_s3 = inlined_call_operand.hbm [shape: f32[2,4,2,128], index: 3, kind: input, shape index: {}]   ;;  %s1375_s4 = inlined_call_operand.hbm [shape: f32[2,3,2,128], index: 4, kind: output, shape index: {0}]   ;;  %s1376_s5 = inlined_call_operand.hbm [shape: f32[2,3,2,128], index: 5, kind: output, shape index: {1}]  }
   0x1   :  { %1382 = sst [smem:[#allocation22_spill]] %s1371_s0 }
   0x2   :  { %1383 = sst [smem:[#allocation23_spill]] %s1372_s1 }
   0x3   :  { %1384 = sst [smem:[#allocation24_spill]] %s1373_s2 }
   0x4   :  { %11 = vsyncpa [#allocation5], 0 }
   0x5   :  { %12 = vsyncpa [#allocation3], 0 }
   0x6   :  { %14 = vsyncpa [#allocation3 + $0x1], 0 }
   0x7   :  { %15 = vsyncpa [#allocation8], 0 }
   0x8   :  { %17 = vsyncpa [#allocation8 + $0x1], 0 }
   0x9   :  { %18 = vsyncpa [#allocation4], 0 }
   0xa   :  { %20 = vsyncpa [#allocation4 + $0x1], 0 }
   0xb   :  { %21 = vsyncpa [#allocation12], 0 }
   0xc   :  { %23 = vsyncpa [#allocation12 + $0x1], 0  ;;  %s1144_s18 = smov 0   ;;  %s1146_s19 = smov 0  }
   0xd   :  { %s1148_s20 = smov 0   ;;  %s1150_s21 = smov 0  }
   0xe   :  { %s1152_s22 = smov 0   ;;  %s1154_s23 = smov 0  }
   0xf LB: > { %1385 = sst [smem:[#allocation18_spill]] %s1105_s22  ;;  %s41_s24 = sadd.s32 1, %s1105_s22  ;;  %s1109_s23 = sphi %s1154_s23, %s29_s23   ;;  %s1105_s22 = sphi %s1152_s22, %s1401_s22   ;;  %s1101_s21 = sphi %s1150_s21, %s1400_s21   ;;  %s1097_s20 = sphi %s1148_s20, %s1404_s20   ;;  %s1093_s19 = sphi %s1146_s19, %s1403_s19   ;;  %s1089_s18 = sphi %s1144_s18, %s1402_s18  }
  0x10   : > { %1386 = sst [smem:[#allocation19_spill]] %s1109_s23  ;;  %s71_s25 = sadd.s32 1, %s1097_s20 }
  0x11   : > { %p43_p0 = scmp.ge.s32.totalorder %s41_s24, 2  ;;  %p78_p1 = scmp.ne.s32.totalorder %s1097_s20, %s1093_s19 }
  0x12   : > { %p79_p2 = scmp.eq.s32.totalorder %s1109_s23, 0  ;;  %p730_p3 = scmp.ge.s32.totalorder %s1109_s23, 2 }
  0x13   : > { %s1406_s24 = smov (%p43_p0, %s41_s24), 0  ;;  %p812_p5 = scmp.lt.s32.totalorder %s1109_s23, 2 }
  0x14   : > { %1387 = sst [smem:[#allocation20_spill]] %s1406_s24  ;;  %p80_p4 = por %p79_p2, %p78_p1 }
  0x15   : > { %s66_s26 = ssub.s32 %s1105_s22, %s1406_s24  ;;  %s1377_s27 = sand.u32 1, %s1097_s20  }
  0x16   : > { %p69_p6 = scmp.eq.s32.totalorder %s66_s26, 0  ;;  %s1191_s28 = sshll.u32 %s1377_s27, 1 }
  0x17   : > { %s1194_s29 = sshll.u32 %s1105_s22, 3  ;;  %p1196_p7 = pnand %p812_p5, %p80_p4 }
  0x18   : > { %s1201_s6 = scalar_select %p69_p6, %s1097_s20, %s71_s25  }
  0x19   : > { %s252_s7 = sand.u32 1, %s1109_s23   ;;  %s1390_s2 = sld [smem:[#allocation24_spill]] }
  0x1a   : > { %1389 = sst [smem:[#allocation21_spill]] %s1201_s6  ;;  %s256_s11 = scalar_lea.vmem [#allocation7], %s1191_s28 }
  0x1b   : > { %s266_s12 = sshll.u32 %s256_s11, 4  ;;  %s1209_s14 = scalar_lea.sflag [#allocation8], %s252_s7  ;;  %s267_s12 = int_to_ptr.vmem [resolvable:$true] %s266_s12 }
  0x1c   : > { %s1215_s15 = sadd.s32 4294967295, %s1109_s23   ;;  %s727_s16 = sadd.s32 4294967294, %s1109_s23  }
  0x1d   : > { %p84_p8 = scmp.ne.s32.totalorder %s1093_s19, %s1089_s18  ;;  %p85_p9 = scmp.eq.s32.totalorder %s1215_s15, 0 }
  0x1e   : > { %p166_p10 = scmp.eq.s32.totalorder %s1215_s15, 1  ;;  %p172_p11 = scmp.eq.s32.totalorder %s727_s16, 1 }
  0x1f   : > { %s262_s10 = scalar_lea.hbm %s1390_s2, %s1194_s29  ;;  %p728_p12 = scmp.ge.s32.totalorder %s1109_s23, 1 }
  0x20   : > { %s264_s13 = sshll.u32 %s262_s10, 4  ;;  %p1225_p13 = por %p85_p9, %p84_p8  ;;  %s265_s13 = int_to_ptr.hbm [resolvable:$true] %s264_s13 }
  0x21   : > { %800 = dma.hbm_to_vmem [thread:$0]  (!%p1196_p7), %s265_s13, 32, %s267_s12, %s1209_s14  }
  0x22   : > { %p1232_p0 = por %p166_p10, %p78_p1  ;;  %p1236_p2 = por %p172_p11, %p84_p8 }
  0x23   : > { %p207_p4 = scmp.lt.s32.totalorder %s1109_s23, 3  ;;  %s1394_s0 = sld [smem:[#allocation22_spill]] }
  0x24   : > { %s1396_s1 = sld [smem:[#allocation23_spill]]  ;;  %s234_s16 = scalar_lea.vmem [#allocation6], %s1191_s28 }
  0x25   : > { %p1244_p5 = pnand %p728_p12, %p207_p4  ;;  %s245_s27 = sshll.u32 %s234_s16, 4  ;;  %s246_s27 = int_to_ptr.vmem [resolvable:$true] %s245_s27 }
  0x26   : > { %s1397_s2 = sand.u32 1, %s1097_s20   ;;  %s612_s11 = scalar_lea.hbm %s1374_s3, %s1194_s29 }
  0x27   : > { %p790_p1 = pneg %p1244_p5  ;;  %s231_s24 = scalar_lea.sflag [#allocation3], %s1397_s2 }
  0x28   : > { %s613_s12 = scalar_lea.hbm %s612_s11, 6  ;;  %s277_s16 = scalar_lea.vmem [#allocation9], %s1191_s28 }
  0x29   : > { %s219_s9 = sshll.u32 %s1394_s0, 4  ;;  %p791_p6 = pnand %p790_p1, %p85_p9  ;;  %s220_s9 = int_to_ptr.hbm [resolvable:$true] %s219_s9 }
  0x2a   : > { %s597_s13 = scalar_lea.hbm %s1396_s1, %s1194_s29  ;;  %s1111_s0 = smov [#allocation2]  }
  0x2b   : > { %s598_s7 = scalar_lea.hbm %s597_s13, 4  ;;  %s288_s1 = sshll.u32 %s277_s16, 4  ;;  %s289_s1 = int_to_ptr.vmem [resolvable:$true] %s288_s1 }
  0x2c   : > { %s243_s8 = sshll.u32 %s598_s7, 4  ;;  %s286_s23 = sshll.u32 %s613_s12, 4  ;;  %s244_s8 = int_to_ptr.hbm [resolvable:$true] %s243_s8  ;;  %s287_s23 = int_to_ptr.hbm [resolvable:$true] %s286_s23 }
  0x2d   : > { %793 = dma.hbm_to_smem (!%p791_p6), %s220_s9, 16, %s1111_s0, [#allocation5]  }
  0x2e   : > { %797 = dma.hbm_to_vmem [thread:$0]  (!%p1196_p7), %s244_s8, 32, %s246_s27, %s231_s24  }
  0x2f   : > { %803 = dma.hbm_to_vmem [thread:$0]  (!%p1196_p7), %s287_s23, 32, %s289_s1, %s1209_s14  }
  0x30   : > { %297 = sbr.rel (%p1244_p5) target bundleno = 136 (0x88), region = 36 }
  0x35   : > { %1068 = dma.done.wait (%p85_p9), [#allocation5], 16  }
  0x36   : > { %1070 = vsyncadd (%p85_p9), [#allocation5], 4294967280  ;;  %s1276_s0 = sand.u32 1, %s1093_s19  }
  0x37   : > { %s1279_s2 = sshll.u32 %s1276_s0, 1  ;;  %s305_s22 = scalar_lea.sflag [#allocation3], %s1276_s0 }
  0x38   : > { %s308_s1 = scalar_lea.vmem [#allocation6], %s1279_s2 }
  0x39   : > { %1072 = dma.done.wait (%p1225_p13), %s305_s22, 32  }
  0x3a   : > { %1074 = vsyncadd (%p1225_p13), %s305_s22, 4294967264  ;;  %s314_s23 = sand.u32 1, %s1215_s15   ;;  %s318_s27 = scalar_lea.vmem [#allocation7], %s1279_s2 }
  0x3b   : > { %s315_s24 = scalar_lea.sflag [#allocation8], %s314_s23 }
  0x3c   : > { %1076 = dma.done.wait (%p1225_p13), %s315_s24, 64  }
  0x3d   : > { %1078 = vsyncadd (%p1225_p13), %s315_s24, 4294967232  ;;  %s328_s28 = scalar_lea.vmem [#allocation9], %s1279_s2 }
  0x3e   : > { %334 = sfence }
  0x3f   : > { %s375_s29 = sld [smem:[#allocation2]]  ;;  %v372_v0 = vld [vmem:[%s308_s1] sm:$0x3]  ;;  %v373_v9 = vld [vmem:[%s318_s27] sm:$0x3]  ;;  %s773_s24 = smul.u32 6, %s1276_s0 }
  0x40   : > { %s745_s30 = sld [smem:[#allocation2 + $0x3]]  ;;  %v374_v13 = vld [vmem:[%s328_s28] sm:$0x3]  ;;  %s774_s27 = smul.u32 6, %s1101_s21 }
  0x41   : > { %s746_s6 = sld [smem:[#allocation2 + $0x1]] }
  0x42   : > { %s747_s14 = sld [smem:[#allocation2 + $0x4]] }
  0x43   : > { %s748_s9 = sld [smem:[#allocation2 + $0x2]] }
  0x44   : > { %s749_s10 = sld [smem:[#allocation2 + $0x5]] }
  0x45   : > { %v376_v1 = vstv %s375_s29  ;;  %s752_s13 = sld [smem:[#allocation2 + $0x6]] }
  0x46   : > { %v377_v2 = vmul.f32 %v376_v1, %v372_v0  ;;  %v379_v3 = vstv %s745_s30  ;;  %s753_s15 = sld [smem:[#allocation2 + $0x7]]  ;;  %s523_s30 = scalar_lea.hbm %s1375_s4, %s774_s27 }
  0x47   : > { %v382_v4 = vstv %s746_s6  ;;  %s754_s7 = sld [smem:[#allocation2 + $0x8]]  ;;  %s364_s6 = scalar_lea.vmem [#allocation10], %s773_s24 }
  0x48   : > { %v380_v5 = vadd.f32 %v379_v3, %v377_v2  ;;  %v383_v6 = vmul.f32 %v382_v4, %v372_v0  ;;  %v385_v7 = vstv %s747_s14  ;;  %s1294_s17 = sld [smem:[#allocation2 + $0xf]]  ;;  %s524_s14 = sshll.u32 %s364_s6, 4  ;;  %s525_s14 = int_to_ptr.vmem [resolvable:$true] %s524_s14 }
  0x49   : > { %v388_v8 = vstv %s748_s9  ;;  %s756_s8 = sld [smem:[#allocation2 + $0x9]]  ;;  %s526_s9 = sshll.u32 %s523_s30, 4  ;;  %s527_s9 = int_to_ptr.hbm [resolvable:$true] %s526_s9 }
  0x4a   : > { %v386_v10 = vadd.f32 %v385_v7, %v383_v6  ;;  %v389_v11 = vmul.f32 %v388_v8, %v372_v0  ;;  %v391_v12 = vstv %s749_s10  ;;  %s757_s11 = sld [smem:[#allocation2 + $0xa]]  ;;  %s506_s10 = scalar_lea.sflag [#allocation4], %s1276_s0 }
  0x4b   : > { %v429_v14 = vstv %s752_s13  ;;  %s758_s12 = sld [smem:[#allocation2 + $0xb]]  ;;  %s1001_s13 = sshra.s32 %s527_s9, 4  ;;  %s1002_s13 = int_to_ptr.hbm [resolvable:$true] %s1001_s13 }
  0x4c   : > { %v392_v15 = vadd.f32 %v391_v12, %v389_v11  ;;  %v393_v16 = vmax.f32 %v380_v5, %v386_v10  ;;  %v430_v17 = vmul.f32 %v429_v14, %v373_v9  ;;  %v432_v18 = vstv %s753_s15  ;;  %s1296_s16 = sld [smem:[#allocation2 + $0x10]]  ;;  %s1003_s15 = scalar_lea.hbm %s1002_s13, 6 }
  0x4d   : > { %v433_v19 = vmul.f32 %v432_v18, %v374_v13  ;;  %v436_v20 = vstv %s754_s7  ;;  %s760_s2 = sld [smem:[#allocation2 + $0xc]]  ;;  %p1004_p7 = scmp.ne.s32.totalorder %s1002_s13, %s1003_s15 }
  0x4e   : > { %v394_v21 = vmax.f32 %v393_v16, %v392_v15  ;;  %v437_v22 = vmul.f32 %v436_v20, %v372_v0  ;;  %s761_s22 = sld [smem:[#allocation2 + $0xd]]  ;;  %v440_v36 = vstv %s1294_s17  ;;  %p1008_p10 = scmp.lt.s32.totalorder %s1002_s13, %s1375_s4 }
  0x4f   : > { %v434_v23 = vadd.f32 %v433_v19, %v430_v17  ;;  %v443_v24 = vstv %s756_s8  ;;  %s762_s1 = sld [smem:[#allocation2 + $0xe]]  ;;  %p1005_p8 = pnand %p1004_p7, %p1232_p0 }
  0x50   : > { %v395_v25 = vsub.f32 %v380_v5, %v394_v21  ;;  %v398_v26 = vsub.f32 %v386_v10, %v394_v21  ;;  %v401_v27 = vsub.f32 %v392_v15, %v394_v21  ;;  %v444_v28 = vmul.f32 %v443_v24, %v373_v9  ;;  %s763_s23 = sld [smem:[#allocation2 + $0x11]]  ;;  %s1007_s8 = scalar_lea.hbm %s1375_s4, 12 }
  0x51   : > { %v438_v29 = vadd.f32 %v437_v22, %v434_v23  ;;  %v446_v30 = vstv %s757_s11  ;;  %v450_v31 = vstv %s758_s12  ;;  %p1006_p9 = pneg %p1005_p8  ;;  %p1009_p11 = scmp.lt.s32.totalorder %s1007_s8, %s1003_s15 }
  0x52   : > { %v396_v32 = vmul.f32 1.442695, %v395_v25  ;;  %v399_v33 = vmul.f32 1.442695, %v398_v26  ;;  %v402_v34 = vmul.f32 1.442695, %v401_v27  ;;  %v447_v35 = vmul.f32 %v446_v30, %v374_v13 }
  0x53   : > { %v451_v37 = vmul.f32 %v450_v31, %v372_v0  ;;  %v457_v38 = vstv %s760_s2  ;;  %v454_v42 = vstv %s1296_s16  ;;  %v441_v45 = vadd.f32 %v440_v36, %v438_v29  ;;  %p1010_p12 = por %p1009_p11, %p1008_p10 }
  0x54   : > { %866 = vpow2.f32 %v396_v32  ;;  %v448_v39 = vadd.f32 %v447_v35, %v444_v28  ;;  %v458_v40 = vmul.f32 %v457_v38, %v373_v9  ;;  %v460_v41 = vstv %s761_s22 }
  0x55   : > { %868 = vpow2.f32 %v399_v33  ;;  %v461_v43 = vmul.f32 %v460_v41, %v374_v13  ;;  %v464_v44 = vstv %s762_s1  ;;  %p1011_p13 = pnand %p1010_p12, %p1006_p9 }
  0x56   : > { %870 = vpow2.f32 %v402_v34  ;;  %v452_v46 = vadd.f32 %v451_v37, %v448_v39  ;;  %v465_v47 = vmul.f32 %v464_v44, %v372_v0  ;;  %v468_v50 = vstv %s763_s23 }
  0x57   : > { %v462_v48 = vadd.f32 %v461_v43, %v458_v40 }
  0x58   : > { %v455_v49 = vadd.f32 %v454_v42, %v452_v46 }
  0x59   : > { %v466_v51 = vadd.f32 %v465_v47, %v462_v48 }
  0x5a   : > { %v867_v52 = vpop.eup %866  ;;  %v470_v53 = vmax.f32 %v441_v45, %v455_v49 }
  0x5b   : > { %v869_v54 = vpop.eup %868  ;;  %v469_v55 = vadd.f32 %v468_v50, %v466_v51 }
  0x5c   : > { %v871_v56 = vpop.eup %870  ;;  %v404_v57 = vadd.f32 %v869_v54, %v867_v52 }
  0x5d   : > { %v471_v58 = vmax.f32 %v470_v53, %v469_v55 }
  0x5e   : > { %v405_v59 = vadd.f32 %v871_v56, %v404_v57 }
  0x5f   : > { %v472_v60 = vsub.f32 %v441_v45, %v471_v58  ;;  %v475_v61 = vsub.f32 %v455_v49, %v471_v58  ;;  %v478_v62 = vsub.f32 %v469_v55, %v471_v58 }
  0x60   : > { %872 = vrcp.f32 %v405_v59  ;;  %v417_v4 = vand.u32 2147483648, %v405_v59  ;;  %vm411_vm0 = vweird.f32 %v405_v59  ;;  %v415_v7 = vand.u32 2147483647, %v405_v59 }
  0x61   : > { %v473_v63 = vmul.f32 1.442695, %v472_v60  ;;  %v476_v0 = vmul.f32 1.442695, %v475_v61  ;;  %v479_v1 = vmul.f32 1.442695, %v478_v62 }
  0x62   : > { %v418_v12 = vor.u32 1.1754944e-38, %v417_v4  ;;  %vm416_vm3 = vcmp.eq.f32.partialorder %v415_v7, 8.507059e+37 }
  0x63   : > { %874 = vpow2.f32 %v473_v63 }
  0x64   : > { %876 = vpow2.f32 %v476_v0 }
  0x65   : > { %878 = vpow2.f32 %v479_v1 }
  0x66   : > { %v873_v2 = vpop.eup %872 }
  0x67   : > { %v407_v3 = vmul.f32 %v873_v2, %v405_v59  ;;  %vm412_vm1 = vweird.f32 %v873_v2 }
  0x68   : > { %vm413_vm2 = vmor %vm411_vm0, %vm412_vm1 }
  0x69   : > { %v1301_v5 = vpop.eup %874  ;;  %v408_v6 = vsub.f32 1.0, %v407_v3 }
  0x6a   : > { %v877_v8 = vpop.eup %876 }
  0x6b   : > { %v879_v9 = vpop.eup %878  ;;  %v409_v10 = vmul.f32 %v873_v2, %v408_v6  ;;  %v481_v11 = vadd.f32 %v877_v8, %v1301_v5 }
  0x6d   : > { %v410_v13 = vadd.f32 %v873_v2, %v409_v10  ;;  %v482_v14 = vadd.f32 %v879_v9, %v481_v11 }
  0x6f   : > { %v414_v15 = vsel %vm413_vm2, %v873_v2, %v410_v13  ;;  %880 = vrcp.f32 %v482_v14 }
  0x70   : > { %v419_v16 = vsel %vm416_vm3, %v418_v12, %v414_v15 }
  0x71   : > { %v420_v17 = vmul.f32 %v867_v52, %v419_v16  ;;  %v422_v18 = vmul.f32 %v869_v54, %v419_v16  ;;  %v425_v19 = vmul.f32 %v871_v56, %v419_v16 }
  0x73   : > { %421 = vst [vmem:[%s364_s6] sm:$0x3] %v420_v17 }
  0x74   : > { %750 = vst [vmem:[%s364_s6 + $0x2] sm:$0x3] %v422_v18 }
  0x75   : > { %v881_v20 = vpop.eup %880  ;;  %751 = vst [vmem:[%s364_s6 + $0x4] sm:$0x3] %v425_v19 }
  0x76   : > { %v484_v21 = vmul.f32 %v881_v20, %v482_v14 }
  0x77   : > { %1014 = shalt.err (!%p1011_p13)
}
  0x78   : > { %s1112_s16 = smov 32   ;;  %s1113_s2 = smov 2   ;;  %v494_v22 = vand.u32 2147483648, %v482_v14  ;;  %v485_v23 = vsub.f32 1.0, %v484_v21  ;;  %vm488_vm4 = vweird.f32 %v482_v14  ;;  %vm489_vm5 = vweird.f32 %v881_v20 }
  0x79   : > { %786 = dma.vmem_to_hbm [thread:$0]  (%p1232_p0), %s525_s14, 96, %s527_s9, %s506_s10, %s1112_s16, %s1112_s16, %s1113_s2   ;;  %v492_v24 = vand.u32 2147483647, %v482_v14  ;;  %vm490_vm6 = vmor %vm488_vm4, %vm489_vm5 }
  0x7a   : > { %v486_v25 = vmul.f32 %v881_v20, %v485_v23  ;;  %v495_v26 = vor.u32 1.1754944e-38, %v494_v22  ;;  %s541_s23 = scalar_lea.hbm %s1376_s5, %s774_s27  ;;  %s371_s28 = scalar_lea.vmem [#allocation11], %s773_s24 }
  0x7b   : > { %vm493_vm7 = vcmp.eq.f32.partialorder %v492_v24, 8.507059e+37  ;;  %s542_s29 = sshll.u32 %s371_s28, 4  ;;  %s544_s30 = sshll.u32 %s541_s23, 4  ;;  %s543_s29 = int_to_ptr.vmem [resolvable:$true] %s542_s29  ;;  %s545_s30 = int_to_ptr.hbm [resolvable:$true] %s544_s30 }
  0x7c   : > { %v487_v27 = vadd.f32 %v881_v20, %v486_v25  ;;  %s511_s21 = scalar_lea.sflag [#allocation12], %s1276_s0  ;;  %s1029_s6 = sshra.s32 %s545_s30, 4  ;;  %s1030_s6 = int_to_ptr.hbm [resolvable:$true] %s1029_s6 }
  0x7d   : > { %s1031_s27 = scalar_lea.hbm %s1030_s6, 6  ;;  %s1035_s9 = scalar_lea.hbm %s1376_s5, 12 }
  0x7e   : > { %v491_v28 = vsel %vm490_vm6, %v881_v20, %v487_v27  ;;  %p1032_p4 = scmp.ne.s32.totalorder %s1030_s6, %s1031_s27  ;;  %p1036_p6 = scmp.lt.s32.totalorder %s1030_s6, %s1376_s5 }
  0x7f   : > { %v496_v29 = vsel %vm493_vm7, %v495_v26, %v491_v28  ;;  %p1037_p7 = scmp.lt.s32.totalorder %s1035_s9, %s1031_s27 }
  0x80   : > { %v497_v30 = vmul.f32 %v1301_v5, %v496_v29  ;;  %v499_v31 = vmul.f32 %v877_v8, %v496_v29  ;;  %v502_v32 = vmul.f32 %v879_v9, %v496_v29  ;;  %p1033_p5 = pnand %p1032_p4, %p1232_p0 }
  0x81   : > { %p1038_p8 = por %p1037_p7, %p1036_p6 }
  0x82   : > { %498 = vst [vmem:[%s371_s28] sm:$0x3] %v497_v30  ;;  %p1034_p1 = pneg %p1033_p5 }
  0x83   : > { %764 = vst [vmem:[%s371_s28 + $0x2] sm:$0x3] %v499_v31 }
  0x84   : > { %765 = vst [vmem:[%s371_s28 + $0x4] sm:$0x3] %v502_v32  ;;  %p1039_p9 = pnand %p1038_p8, %p1034_p1 }
  0x86   : > { %1042 = shalt.err (!%p1039_p9)
}
  0x87   : > { %787 = dma.vmem_to_hbm [thread:$0]  (%p1232_p0), %s543_s29, 96, %s545_s30, %s511_s21, %s1112_s16, %s1112_s16, %s1113_s2  }
  0x88 PF: > { %s1398_s0 = sld [smem:[#allocation19_spill]]  ;;  %s559_s15 = sand.u32 1, %s1089_s18  }
  0x89   : > { %p805_p10 = pnand %p730_p3, %p1236_p2  ;;  %s560_s7 = scalar_lea.sflag [#allocation4], %s559_s15 }
  0x8b   : > { %p806_p11 = pneg %p805_p10 }
  0x8d   : > { %1080 = dma.done.wait (%p806_p11), %s560_s7, 96  }
  0x8e   : > { %1082 = vsyncadd (%p806_p11), %s560_s7, 4294967200  ;;  %s570_s17 = scalar_lea.sflag [#allocation12], %s559_s15 }
  0x8f   : > { %1084 = dma.done.wait (%p806_p11), %s570_s17, 96  }
  0x90   : > { %1086 = vsyncadd (%p806_p11), %s570_s17, 4294967200  ;;  %s29_s23 = sadd.s32 1, %s1398_s0   ;;  %s1399_s25 = sld [smem:[#allocation21_spill]] }
  0x91   : > { %p26_p12 = scmp.ge.s32.totalorder %s29_s23, 4   ;;  %s1400_s21 = sld [smem:[#allocation18_spill]] }
  0x92   : > { %s1401_s22 = sld [smem:[#allocation20_spill]]  ;;  %s1402_s18 = smov %s1093_s19 }
  0x93   : > { %s1403_s19 = smov %s1097_s20  ;;  %28 = sbr.rel (!%p26_p12) target bundleno = 15 (0xf), region = 131 }
  0x96   : > { %s1404_s20 = smov %s1399_s25 }
  0x98   :  { %576 = vsyncpa [#allocation3], 1 }
  0x99   :  { %578 = vsyncpa [#allocation3 + $0x1], 1 }
  0x9a   :  { %579 = vsyncpa [#allocation8], 1 }
  0x9b   :  { %581 = vsyncpa [#allocation8 + $0x1], 1 }
  0x9c   :  { %582 = vsyncpa [#allocation4], 1 }
  0x9d   :  { %584 = vsyncpa [#allocation4 + $0x1], 1 }
  0x9e   :  { %585 = vsyncpa [#allocation12], 1 }
  0x9f   :  { %587 = vsyncpa [#allocation12 + $0x1], 1 }
  0xa0   :  { %588 = vsyncpa [#allocation5], 1 }
  0xa1   :  { %590 = vsyncpa [#allocation5 + $0x1], 1 }

</bundles_post_ra>
